<compile_context>
chip_gen: v6e
topology: v6e:2x2x1
jax: 0.10.0
libtpu: 0.0.40
codegen_flags: <defaults>
</compile_context>

<pallas_src>
import jax
import jax.numpy as jnp
from jax import lax
from jax.experimental import pallas as pl
from jax.experimental.pallas import tpu as pltpu


def classifier_kernel(ids_ref, pool_ref, emb_ref, w_ref, bias_ref, out_ref):
    """Single-step kernel: one-hot gather on the MXU, mean-pool matmul
    (1/S folded into pool_ref), classifier matmul + bias, one dense store."""
    BS = ids_ref.shape[0]
    V = emb_ref.shape[0]

    ids = ids_ref[...]                                           # (BS, 1) int32
    vocab = lax.broadcasted_iota(jnp.int32, (BS, V), 1)          # lane iota
    onehot = (ids == vocab).astype(jnp.float32)                  # (BS, V)

    # Gather all B*S embedding rows in one MXU matmul.
    per_tok = jnp.dot(onehot, emb_ref[...],
                      preferred_element_type=jnp.float32)        # (BS, E)
    # Mean over the sequence (pool_ref[b, b*S + s] = 1/S).
    pooled = jnp.dot(pool_ref[...], per_tok,
                     preferred_element_type=jnp.float32)         # (B, E)
    # Classifier (weight already transposed and lane-padded).
    logits = jnp.dot(pooled, w_ref[...],
                     preferred_element_type=jnp.float32)         # (B, CP)
    out_ref[...] = logits + bias_ref[...]


def multiclass_classifier_forward(x_ids, emb_table, w, bias):
    """x_ids: (B, S) int32; emb_table: (V, E); w: (C, E); bias: (C,) -> (B, C) f32."""
    B, S = x_ids.shape
    V, E = emb_table.shape
    C = w.shape[0]
    BS = B * S

    LANE = 128
    CP = ((C + LANE - 1) // LANE) * LANE  # pad classifier N-dim to full lanes

    # VMEM-resident table path only (256 KB for the shipped config).
    table_bytes = V * E * jnp.dtype(emb_table.dtype).itemsize
    assert table_bytes <= 8 * 1024 * 1024, (
        "embedding table too large for the VMEM-resident path; "
        "use an HBM-gather kernel instead")

    ids2d = x_ids.reshape(BS, 1).astype(jnp.int32)               # (BS, 1)
    # pool[b, b*S + s] = 1/S  (row-major flatten matches ids2d ordering).
    pool = jnp.repeat(jnp.eye(B, dtype=jnp.float32), S, axis=1) / S   # (B, BS)
    w_pad = jnp.zeros((E, CP), jnp.float32).at[:, :C].set(
        w.T.astype(jnp.float32))                                 # (E, CP)
    b_pad = jnp.zeros((1, CP), jnp.float32).at[:, :C].set(
        bias.reshape(1, C).astype(jnp.float32))                  # (1, CP)
    emb_f32 = emb_table.astype(jnp.float32)                      # (V, E)

    out = pl.pallas_call(
        classifier_kernel,
        out_shape=jax.ShapeDtypeStruct((B, CP), jnp.float32),
        grid=(1,),
        in_specs=[
            pl.BlockSpec((BS, 1), lambda i: (0, 0)),   # token ids
            pl.BlockSpec((B, BS), lambda i: (0, 0)),   # mean-pool matrix (1/S folded)
            pl.BlockSpec((V, E), lambda i: (0, 0)),    # embedding table, VMEM-resident
            pl.BlockSpec((E, CP), lambda i: (0, 0)),   # W^T, lane-padded
            pl.BlockSpec((1, CP), lambda i: (0, 0)),   # bias, lane-padded
        ],
        out_specs=pl.BlockSpec((B, CP), lambda i: (0, 0)),
        compiler_params=pltpu.CompilerParams(
            dimension_semantics=("arbitrary",),
            vmem_limit_bytes=32 * 1024 * 1024),
    )(ids2d, pool, emb_f32, w_pad, b_pad)

    return out[:, :C]


if __name__ == "__main__":
    # Small, deterministic configuration consistent with the module's forward.
    B, S = 8, 16          # batch, sequence length
    V, E = 512, 128       # vocab_size, embedding_dim
    C = 8                 # n_classes
    PADDING_IDX = 0       # sp.piece_to_id('<PAD>')

    key = jax.random.PRNGKey(0)
    k_ids, k_emb, k_w, k_b = jax.random.split(key, 4)

    # Token ids (include some padding tokens).
    x_ids = jax.random.randint(k_ids, (B, S), 0, V, dtype=jnp.int32)

    # nn.Embedding(V, E, padding_idx=PADDING_IDX): zero out the padding row.
    emb_table = jax.random.normal(k_emb, (V, E), dtype=jnp.float32) * 0.02
    emb_table = emb_table.at[PADDING_IDX].set(0.0)

    # nn.Linear(E, C): weight (C, E), bias (C,).
    w = jax.random.normal(k_w, (C, E), dtype=jnp.float32) * 0.05
    b = jax.random.normal(k_b, (C,), dtype=jnp.float32) * 0.05

    out = multiclass_classifier_forward(x_ids, emb_table, w, b)
    out = jax.block_until_ready(out)

    # Plain-JAX reference of the PyTorch forward.
    ref = jnp.take(emb_table, x_ids, axis=0).mean(axis=1) @ w.T + b
    assert out.shape == (B, C)
    assert jnp.allclose(out, ref, atol=1e-3, rtol=1e-3), "mismatch vs reference"

    print("KERNEL_OK")
</pallas_src>

<mosaic_0001>
module attributes {stable_mosaic.version = 11 : i64} {
  func.func @classifier_kernel(%arg0: i32, %arg1: memref<128x1xi32, #tpu.memory_space<vmem>>, %arg2: memref<8x128xf32, #tpu.memory_space<vmem>>, %arg3: memref<512x128xf32, #tpu.memory_space<vmem>>, %arg4: memref<128x128xf32, #tpu.memory_space<vmem>>, %arg5: memref<1x128xf32, #tpu.memory_space<vmem>>, %arg6: memref<8x128xf32, #tpu.memory_space<vmem>>) attributes {dimension_semantics = [#tpu.dimension_semantics<arbitrary>], iteration_bounds = array<i64: 1>, scalar_prefetch = 0 : i64, scratch_operands = 0 : i64, tpu.core_type = #tpu.core_type<tc>, window_params = [{pipeline_mode = #tpu.pipeline_mode<synchronous>, transform_indices = @transform_0, window_bounds = array<i64: 128, 1>}, {pipeline_mode = #tpu.pipeline_mode<synchronous>, transform_indices = @transform_1, window_bounds = array<i64: 8, 128>}, {pipeline_mode = #tpu.pipeline_mode<synchronous>, transform_indices = @transform_2, window_bounds = array<i64: 512, 128>}, {pipeline_mode = #tpu.pipeline_mode<synchronous>, transform_indices = @transform_3, window_bounds = array<i64: 128, 128>}, {pipeline_mode = #tpu.pipeline_mode<synchronous>, transform_indices = @transform_4, window_bounds = array<i64: 1, 128>}, {pipeline_mode = #tpu.pipeline_mode<synchronous>, transform_indices = @transform_5, window_bounds = array<i64: 8, 128>}]} {
    %c0 = arith.constant 0 : index
    %c0_0 = arith.constant 0 : index
    %0 = vector.load %arg1[%c0, %c0_0] : memref<128x1xi32, #tpu.memory_space<vmem>>, vector<128x1xi32>
    %1 = tpu.iota {dimensions = array<i32: 1>} : vector<128x512xi32>
    %2 = vector.broadcast %0 : vector<128x1xi32> to vector<128x512xi32>
    %3 = arith.cmpi eq, %2, %1 : vector<128x512xi32>
    %4 = arith.extui %3 : vector<128x512xi1> to vector<128x512xi32>
    %5 = arith.sitofp %4 : vector<128x512xi32> to vector<128x512xf32>
    %c0_1 = arith.constant 0 : index
    %c0_2 = arith.constant 0 : index
    %6 = vector.load %arg3[%c0_1, %c0_2] : memref<512x128xf32, #tpu.memory_space<vmem>>, vector<512x128xf32>
    %cst = arith.constant dense<0.000000e+00> : vector<128x128xf32>
    %7 = tpu.matmul %5, %6, %cst {dimension_numbers = #tpu.dot_dimension_numbers<[1], [0], [0], [1], [0, 0, 1, 1], [], []>} : vector<128x512xf32>, vector<512x128xf32>, vector<128x128xf32> -> vector<128x128xf32>
    %c0_3 = arith.constant 0 : index
    %c0_4 = arith.constant 0 : index
    %8 = vector.load %arg2[%c0_3, %c0_4] : memref<8x128xf32, #tpu.memory_space<vmem>>, vector<8x128xf32>
    %cst_5 = arith.constant dense<0.000000e+00> : vector<8x128xf32>
    %9 = tpu.matmul %8, %7, %cst_5 {dimension_numbers = #tpu.dot_dimension_numbers<[1], [0], [0], [1], [0, 0, 1, 1], [], []>} : vector<8x128xf32>, vector<128x128xf32>, vector<8x128xf32> -> vector<8x128xf32>
    %c0_6 = arith.constant 0 : index
    %c0_7 = arith.constant 0 : index
    %10 = vector.load %arg4[%c0_6, %c0_7] : memref<128x128xf32, #tpu.memory_space<vmem>>, vector<128x128xf32>
    %cst_8 = arith.constant dense<0.000000e+00> : vector<8x128xf32>
    %11 = tpu.matmul %9, %10, %cst_8 {dimension_numbers = #tpu.dot_dimension_numbers<[1], [0], [0], [1], [0, 0, 1, 1], [], []>} : vector<8x128xf32>, vector<128x128xf32>, vector<8x128xf32> -> vector<8x128xf32>
    %c0_9 = arith.constant 0 : index
    %c0_10 = arith.constant 0 : index
    %12 = vector.load %arg5[%c0_9, %c0_10] : memref<1x128xf32, #tpu.memory_space<vmem>>, vector<1x128xf32>
    %13 = vector.broadcast %12 : vector<1x128xf32> to vector<8x128xf32>
    %14 = arith.addf %11, %13 : vector<8x128xf32>
    %c0_11 = arith.constant 0 : index
    %c0_12 = arith.constant 0 : index
    %15 = vector.load %arg6[%c0_11, %c0_12] : memref<8x128xf32, #tpu.memory_space<vmem>>, vector<8x128xf32>
    tpu.vector_store %arg6[%c0_11, %c0_12], %14 {strides = array<i32>} : memref<8x128xf32, #tpu.memory_space<vmem>>, vector<8x128xf32>,
    return
  }
  func.func @transform_0(%arg0: i32) -> (i32, i32) {
    %c0_i32 = arith.constant 0 : i32
    %c0_i32_0 = arith.constant 0 : i32
    %c0_i32_1 = arith.constant 0 : i32
    return %c0_i32, %c0_i32_0 : i32, i32
  }
  func.func @transform_1(%arg0: i32) -> (i32, i32) {
    %c0_i32 = arith.constant 0 : i32
    %c0_i32_0 = arith.constant 0 : i32
    %c0_i32_1 = arith.constant 0 : i32
    return %c0_i32, %c0_i32_0 : i32, i32
  }
  func.func @transform_2(%arg0: i32) -> (i32, i32) {
    %c0_i32 = arith.constant 0 : i32
    %c0_i32_0 = arith.constant 0 : i32
    %c0_i32_1 = arith.constant 0 : i32
    return %c0_i32, %c0_i32_0 : i32, i32
  }
  func.func @transform_3(%arg0: i32) -> (i32, i32) {
    %c0_i32 = arith.constant 0 : i32
    %c0_i32_0 = arith.constant 0 : i32
    %c0_i32_1 = arith.constant 0 : i32
    return %c0_i32, %c0_i32_0 : i32, i32
  }
  func.func @transform_4(%arg0: i32) -> (i32, i32) {
    %c0_i32 = arith.constant 0 : i32
    %c0_i32_0 = arith.constant 0 : i32
    %c0_i32_1 = arith.constant 0 : i32
    return %c0_i32, %c0_i32_0 : i32, i32
  }
  func.func @transform_5(%arg0: i32) -> (i32, i32) {
    %c0_i32 = arith.constant 0 : i32
    %c0_i32_0 = arith.constant 0 : i32
    %c0_i32_1 = arith.constant 0 : i32
    return %c0_i32, %c0_i32_0 : i32, i32
  }
}

</mosaic_0001>

<bundles_post_ra>
// kernel: tpu_custom_call.1
= control target key start
LH: loop header
LB: loop body
LE: loop exit
PB: predicated region body
PF: predicated region fallthrough
CT: control target
= control target key end

     0   :  { %10 = vsyncpa [#allocation3], 0  ;;  %s1684_s0 = inlined_call_operand.vmem [shape: s32[128,1], index: 0, kind: input, shape index: {}]   ;;  %s1685_s1 = inlined_call_operand.hbm [shape: f32[8,128], index: 1, kind: input, shape index: {}]   ;;  %s1686_s2 = inlined_call_operand.hbm [shape: f32[512,128], index: 2, kind: input, shape index: {}]   ;;  %s1687_s3 = inlined_call_operand.vmem [shape: f32[128,128], index: 3, kind: input, shape index: {}]   ;;  %s1688_s4 = inlined_call_operand.vmem [shape: f32[1,128], index: 4, kind: input, shape index: {}]   ;;  %s1689_s5 = inlined_call_operand.hbm [shape: f32[8,128], index: 5, kind: output, shape index: {}]  }
   0x1   :  { %11 = vsyncpa [#allocation6], 0 }
   0x2   :  { %12 = vsyncpa [#allocation4], 0  ;;  %s1313_s18 = smov [#allocation2]   ;;  %s1314_s20 = smov [#allocation5]  }
   0x3   :  { %s21_s19 = sshll.u32 %s1313_s18, 4  ;;  %s30_s21 = sshll.u32 %s1314_s20, 4  ;;  %s22_s19 = int_to_ptr.vmem [resolvable:$true] %s21_s19  ;;  %s31_s21 = int_to_ptr.vmem [resolvable:$true] %s30_s21 }
   0x4   :  { %s1255_s22 = scalar_lea.vmem %s22_s19, 128  ;;  %p1260_p1 = scmp.lt.s32.totalorder %s22_s19, %s22_s19 }
   0x5   :  { %p1256_p0 = scmp.ne.s32.totalorder %s22_s19, %s1255_s22  ;;  %p1261_p2 = scmp.lt.s32.totalorder %s1255_s22, %s1255_s22 }
   0x7   :  { %p1262_p3 = por %p1261_p2, %p1260_p1 }
   0x9   :  { %p1263_p4 = pnand %p1262_p3, %p1256_p0 }
   0xb   :  { %1266 = shalt.err (!%p1263_p4)
}
   0xc   :  { %24 = dma.hbm_to_vmem [thread:$0]  %s1685_s1, 128, %s22_s19, [#allocation3]  }
   0xd   :  { %s1275_s25 = scalar_lea.vmem %s31_s21, 8192  ;;  %p1280_p6 = scmp.lt.s32.totalorder %s31_s21, %s31_s21 }
   0xe   :  { %p1276_p5 = scmp.ne.s32.totalorder %s31_s21, %s1275_s25  ;;  %p1281_p7 = scmp.lt.s32.totalorder %s1275_s25, %s1275_s25 }
  0x10   :  { %p1282_p8 = por %p1281_p7, %p1280_p6 }
  0x12   :  { %p1283_p9 = pnand %p1282_p8, %p1276_p5 }
  0x14   :  { %1286 = shalt.err (!%p1283_p9)
}
  0x15   :  { %s1315_s26 = smov 128   ;;  %s1316_s27 = smov 8  }
  0x16   :  { %36 = dma.hbm_to_vmem [thread:$0]  %s1686_s2, 8192, %s31_s21, [#allocation6], %s1315_s26, %s1315_s26, %s1316_s27  }
  0x17   :  { %1307 = dma.done.wait [#allocation3], 128  }
  0x18   :  { %1308 = vsyncadd [#allocation3], 4294967168 }
  0x19   :  { %1309 = dma.done.wait [#allocation6], 8192  }
  0x1a   :  { %1310 = vsyncadd [#allocation6], 4294959104  ;;  %v1317_v0 = vmov 0   ;;  %v49_v1 = vld [vmem:[%s1684_s0 + $0x10] sm:$0xff]  ;;  %v47_v2 = vld [vmem:[%s1684_s0] sm:$0xff]  ;;  %s1321_s12 = smov [#allocation7]  }
  0x1b   :  { %1246 = vset.pattern.permute.xlu1 %v1317_v0  ;;  %1245 = vset.pattern.permute.xlu0 %v1317_v0  ;;  %v50_v3 = vld [vmem:[%s1684_s0 + $0x18] sm:$0xff]  ;;  %v48_v4 = vld [vmem:[%s1684_s0 + $0x8] sm:$0xff]  ;;  %v51_v6 = vld [vmem:[%s1684_s0 + $0x20] sm:$0xff]  ;;  %s833_s13 = sshll.u32 %s1321_s12, 4  ;;  %s834_s13 = int_to_ptr.vmem [resolvable:$true] %s833_s13 }
  0x1c   :  { %75 = vperm.xlu1 %1246, %v49_v1   ;;  %69 = vperm.xlu0 %1245, %v47_v2   ;;  %v52_v5 = vld [vmem:[%s1684_s0 + $0x28] sm:$0xff]  ;;  %v339_v7 = vld [vmem:[#allocation5 + $0xf8] sm:$0xff]  ;;  %v338_v11 = vld [vmem:[#allocation5 + $0xf0] sm:$0xff]  ;;  %s1287_s14 = scalar_lea.vmem %s834_s13, 128  ;;  %p1292_p11 = scmp.lt.s32.totalorder %s834_s13, %s834_s13 }
  0x1d   :  { %v371_v8 = vld [vmem:[#allocation5 + $0x1f8] sm:$0xff]  ;;  %972 = vmatprep.subr.mxu0 %v339_v7  ;;  %v370_v12 = vld [vmem:[#allocation5 + $0x1f0] sm:$0xff]  ;;  %v337_v15 = vld [vmem:[#allocation5 + $0xe8] sm:$0xff]  ;;  %p1288_p10 = scmp.ne.s32.totalorder %s834_s13, %s1287_s14  ;;  %p1293_p12 = scmp.lt.s32.totalorder %s1287_s14, %s1287_s14 }
  0x1e   :  { %1052 = vmatprep.subr.mxu1 %v371_v8  ;;  %v323_v9 = vld [vmem:[#allocation5 + $0x78] sm:$0xff]  ;;  %v322_v13 = vld [vmem:[#allocation5 + $0x70] sm:$0xff]  ;;  %v369_v16 = vld [vmem:[#allocation5 + $0x1e8] sm:$0xff] }
  0x1f   :  { %v355_v10 = vld [vmem:[#allocation5 + $0x178] sm:$0xff]  ;;  %973 = vmatpush3.msra.mxu0 %v323_v9  ;;  %v354_v14 = vld [vmem:[#allocation5 + $0x170] sm:$0xff]  ;;  %v321_v17 = vld [vmem:[#allocation5 + $0x68] sm:$0xff]  ;;  %p1294_p13 = por %p1293_p12, %p1292_p11 }
  0x20   :  { %78 = vperm.xlu1 %1246, %v50_v3   ;;  %72 = vperm.xlu0 %1245, %v48_v4   ;;  %v353_v18 = vld [vmem:[#allocation5 + $0x168] sm:$0xff]  ;;  %v54_v19 = vld [vmem:[%s1684_s0 + $0x38] sm:$0xff]  ;;  %v336_v21 = vld [vmem:[#allocation5 + $0xe0] sm:$0xff] }
  0x21   :  { %1053 = vmatpush3.msra.mxu1 %v355_v10  ;;  %974 = vmatprep.subr.mxu0 %v338_v11  ;;  %v53_v20 = vld [vmem:[%s1684_s0 + $0x30] sm:$0xff]  ;;  %v368_v22 = vld [vmem:[#allocation5 + $0x1e0] sm:$0xff]  ;;  %v335_v25 = vld [vmem:[#allocation5 + $0xd8] sm:$0xff]  ;;  %p1295_p0 = pnand %p1294_p13, %p1288_p10 }
  0x22   :  { %1054 = vmatprep.subr.mxu1 %v370_v12  ;;  %975 = vmatpush3.msra.mxu0 %v322_v13  ;;  %v320_v23 = vld [vmem:[#allocation5 + $0x60] sm:$0xff]  ;;  %v367_v26 = vld [vmem:[#allocation5 + $0x1d8] sm:$0xff]  ;;  %v334_v31 = vld [vmem:[#allocation5 + $0xd0] sm:$0xff] }
  0x23   :  { %1055 = vmatpush3.msra.mxu1 %v354_v14  ;;  %976 = vmatprep.subr.mxu0 %v337_v15  ;;  %v352_v24 = vld [vmem:[#allocation5 + $0x160] sm:$0xff]  ;;  %v55_v28 = vld [vmem:[%s1684_s0 + $0x40] sm:$0xff]  ;;  %v366_v32 = vld [vmem:[#allocation5 + $0x1d0] sm:$0xff] }
  0x24   :  { %84 = vperm.xlu1 %1246, %v52_v5   ;;  %81 = vperm.xlu0 %1245, %v51_v6   ;;  %v56_v27 = vld [vmem:[%s1684_s0 + $0x48] sm:$0xff]  ;;  %v319_v29 = vld [vmem:[#allocation5 + $0x58] sm:$0xff]  ;;  %v318_v33 = vld [vmem:[#allocation5 + $0x50] sm:$0xff] }
  0x25   :  { %1056 = vmatprep.subr.mxu1 %v369_v16  ;;  %977 = vmatpush3.msra.mxu0 %v321_v17  ;;  %v351_v30 = vld [vmem:[#allocation5 + $0x158] sm:$0xff]  ;;  %v350_v34 = vld [vmem:[#allocation5 + $0x150] sm:$0xff]  ;;  %v57_v36 = vld [vmem:[%s1684_s0 + $0x50] sm:$0xff]  ;;  %v63_v17 = vlaneseq }
  0x26   :  { %1057 = vmatpush3.msra.mxu1 %v353_v18  ;;  %978 = vmatprep.subr.mxu0 %v336_v21  ;;  %v58_v35 = vld [vmem:[%s1684_s0 + $0x58] sm:$0xff]  ;;  %v333_v37 = vld [vmem:[#allocation5 + $0xc8] sm:$0xff]  ;;  %v332_v41 = vld [vmem:[#allocation5 + $0xc0] sm:$0xff] }
  0x27   :  { %1058 = vmatprep.subr.mxu1 %v368_v22  ;;  %979 = vmatpush3.msra.mxu0 %v320_v23  ;;  %v365_v38 = vld [vmem:[#allocation5 + $0x1c8] sm:$0xff]  ;;  %v364_v42 = vld [vmem:[#allocation5 + $0x1c0] sm:$0xff]  ;;  %v59_v44 = vld [vmem:[%s1684_s0 + $0x60] sm:$0xff]  ;;  %v1406_v18 = vand.u32 127, %v63_v17  ;;  %v1318_v23 = vmov 1.0  }
  0x28   :  { %90 = vperm.xlu1 %1246, %v54_v19   ;;  %87 = vperm.xlu0 %1245, %v53_v20   ;;  %v317_v39 = vld [vmem:[#allocation5 + $0x48] sm:$0xff]  ;;  %v60_v43 = vld [vmem:[%s1684_s0 + $0x68] sm:$0xff]  ;;  %v331_v47 = vld [vmem:[#allocation5 + $0xb8] sm:$0xff] }
  0x29   :  { %1059 = vmatpush3.msra.mxu1 %v352_v24  ;;  %980 = vmatprep.subr.mxu0 %v335_v25  ;;  %v349_v40 = vld [vmem:[#allocation5 + $0x148] sm:$0xff]  ;;  %v316_v45 = vld [vmem:[#allocation5 + $0x40] sm:$0xff]  ;;  %v363_v48 = vld [vmem:[#allocation5 + $0x1b8] sm:$0xff]  ;;  %v1409_v19 = vadd.s32 128, %v1406_v18  ;;  %v1412_v20 = vadd.s32 384, %v1406_v18  ;;  %v1415_v21 = vadd.s32 256, %v1406_v18 }
  0x2a   :  { %1060 = vmatprep.subr.mxu1 %v367_v26  ;;  %981 = vmatpush3.msra.mxu0 %v319_v29  ;;  %v348_v46 = vld [vmem:[#allocation5 + $0x140] sm:$0xff]  ;;  %v315_v49 = vld [vmem:[#allocation5 + $0x38] sm:$0xff]  ;;  %v62_v51 = vld [vmem:[%s1684_s0 + $0x78] sm:$0xff] }
  0x2b   :  { %1061 = vmatpush3.msra.mxu1 %v351_v30  ;;  %982 = vmatprep.subr.mxu0 %v334_v31  ;;  %v347_v50 = vld [vmem:[#allocation5 + $0x138] sm:$0xff]  ;;  %v61_v52 = vld [vmem:[%s1684_s0 + $0x70] sm:$0xff]  ;;  %v330_v53 = vld [vmem:[#allocation5 + $0xb0] sm:$0xff] }
  0x2c   :  { %96 = vperm.xlu1 %1246, %v56_v27   ;;  %93 = vperm.xlu0 %1245, %v55_v28   ;;  %v362_v54 = vld [vmem:[#allocation5 + $0x1b0] sm:$0xff]  ;;  %v329_v57 = vld [vmem:[#allocation5 + $0xa8] sm:$0xff]  ;;  %v328_v61 = vld [vmem:[#allocation5 + $0xa0] sm:$0xff] }
  0x2d   :  { %1062 = vmatprep.subr.mxu1 %v366_v32  ;;  %983 = vmatpush3.msra.mxu0 %v318_v33  ;;  %v314_v55 = vld [vmem:[#allocation5 + $0x30] sm:$0xff]  ;;  %v361_v58 = vld [vmem:[#allocation5 + $0x1a8] sm:$0xff]  ;;  %v360_v62 = vld [vmem:[#allocation5 + $0x1a0] sm:$0xff] }
  0x2e   :  { %1063 = vmatpush3.msra.mxu1 %v350_v34  ;;  %984 = vmatprep.subr.mxu0 %v333_v37  ;;  %v346_v56 = vld [vmem:[#allocation5 + $0x130] sm:$0xff]  ;;  %v313_v59 = vld [vmem:[#allocation5 + $0x28] sm:$0xff]  ;;  %v312_v63 = vld [vmem:[#allocation5 + $0x20] sm:$0xff] }
  0x2f   :  { %1064 = vmatprep.subr.mxu1 %v365_v38  ;;  %985 = vmatpush3.msra.mxu0 %v317_v39  ;;  %v345_v60 = vld [vmem:[#allocation5 + $0x128] sm:$0xff]  ;;  %v344_v0 = vld [vmem:[#allocation5 + $0x120] sm:$0xff]  ;;  %v327_v1 = vld [vmem:[#allocation5 + $0x98] sm:$0xff]  ;;  %v1319_v39 = vmov 0.0  }
  0x30   :  { %102 = vperm.xlu1 %1246, %v58_v35   ;;  %99 = vperm.xlu0 %1245, %v57_v36   ;;  %v359_v2 = vld [vmem:[#allocation5 + $0x198] sm:$0xff]  ;;  %v326_v5 = vld [vmem:[#allocation5 + $0x90] sm:$0xff]  ;;  %v325_v9 = vld [vmem:[#allocation5 + $0x88] sm:$0xff] }
  0x31   :  { %1065 = vmatpush3.msra.mxu1 %v349_v40  ;;  %986 = vmatprep.subr.mxu0 %v332_v41  ;;  %v311_v3 = vld [vmem:[#allocation5 + $0x18] sm:$0xff]  ;;  %v358_v6 = vld [vmem:[#allocation5 + $0x190] sm:$0xff]  ;;  %v357_v10 = vld [vmem:[#allocation5 + $0x188] sm:$0xff] }
  0x32   :  { %1066 = vmatprep.subr.mxu1 %v364_v42  ;;  %987 = vmatpush3.msra.mxu0 %v316_v45  ;;  %v343_v4 = vld [vmem:[#allocation5 + $0x118] sm:$0xff]  ;;  %v310_v7 = vld [vmem:[#allocation5 + $0x10] sm:$0xff]  ;;  %v309_v11 = vld [vmem:[#allocation5 + $0x8] sm:$0xff] }
  0x33   :  { %1067 = vmatpush3.msra.mxu1 %v348_v46  ;;  %988 = vmatprep.subr.mxu0 %v331_v47  ;;  %v342_v8 = vld [vmem:[#allocation5 + $0x110] sm:$0xff]  ;;  %v341_v12 = vld [vmem:[#allocation5 + $0x108] sm:$0xff]  ;;  %v324_v13 = vld [vmem:[#allocation5 + $0x80] sm:$0xff] }
  0x34   :  { %108 = vperm.xlu1 %1246, %v60_v43   ;;  %105 = vperm.xlu0 %1245, %v59_v44   ;;  %v356_v14 = vld [vmem:[#allocation5 + $0x180] sm:$0xff]  ;;  %v748_v40 = vld [vmem:[%s1687_s3 + $0x78] sm:$0xff]  ;;  %v747_v41 = vld [vmem:[%s1687_s3 + $0x70] sm:$0xff] }
  0x35   :  { %1068 = vmatprep.subr.mxu1 %v363_v48  ;;  %989 = vmatpush3.msra.mxu0 %v315_v49  ;;  %v308_v15 = vld [vmem:[#allocation5] sm:$0xff]  ;;  %v745_v43 = vld [vmem:[%s1687_s3 + $0x60] sm:$0xff]  ;;  %v744_v44 = vld [vmem:[%s1687_s3 + $0x58] sm:$0xff] }
  0x36   :  { %1069 = vmatpush3.msra.mxu1 %v347_v50  ;;  %990 = vmatprep.subr.mxu0 %v330_v53  ;;  %v340_v16 = vld [vmem:[#allocation5 + $0x100] sm:$0xff]  ;;  %v743_v45 = vld [vmem:[%s1687_s3 + $0x50] sm:$0xff]  ;;  %v741_v47 = vld [vmem:[%s1687_s3 + $0x40] sm:$0xff] }
  0x37   :  { %1070 = vmatprep.subr.mxu1 %v362_v54  ;;  %991 = vmatpush3.msra.mxu0 %v314_v55  ;;  %v746_v42 = vld [vmem:[%s1687_s3 + $0x68] sm:$0xff]  ;;  %v740_v48 = vld [vmem:[%s1687_s3 + $0x38] sm:$0xff]  ;;  %v739_v49 = vld [vmem:[%s1687_s3 + $0x30] sm:$0xff] }
  0x38   :  { %114 = vperm.xlu1 %1246, %v62_v51   ;;  %111 = vperm.xlu0 %1245, %v61_v52   ;;  %v742_v46 = vld [vmem:[%s1687_s3 + $0x48] sm:$0xff]  ;;  %v737_v51 = vld [vmem:[%s1687_s3 + $0x20] sm:$0xff]  ;;  %v736_v52 = vld [vmem:[%s1687_s3 + $0x18] sm:$0xff] }
  0x39   :  { %1071 = vmatpush3.msra.mxu1 %v346_v56  ;;  %992 = vmatprep.subr.mxu0 %v329_v57  ;;  %v738_v50 = vld [vmem:[%s1687_s3 + $0x28] sm:$0xff]  ;;  %v735_v53 = vld [vmem:[%s1687_s3 + $0x10] sm:$0xff]  ;;  %v733_v55 = vld [vmem:[%s1687_s3] sm:$0xff] }
  0x3a   :  { %1072 = vmatprep.subr.mxu1 %v361_v58  ;;  %993 = vmatpush3.msra.mxu0 %v313_v59  ;;  %v734_v54 = vld [vmem:[%s1687_s3 + $0x8] sm:$0xff] }
  0x3b   :  { %1073 = vmatpush3.msra.mxu1 %v345_v60  ;;  %994 = vmatprep.subr.mxu0 %v328_v61 }
  0x3c   :  { %1074 = vmatprep.subr.mxu1 %v360_v62  ;;  %995 = vmatpush3.msra.mxu0 %v312_v63 }
  0x3d   :  { %1075 = vmatpush3.msra.mxu1 %v344_v0  ;;  %996 = vmatprep.subr.mxu0 %v327_v1 }
  0x3e   :  { %1076 = vmatprep.subr.mxu1 %v359_v2  ;;  %997 = vmatpush3.msra.mxu0 %v311_v3 }
  0x3f   :  { %1077 = vmatpush3.msra.mxu1 %v343_v4  ;;  %998 = vmatprep.subr.mxu0 %v326_v5 }
  0x40   :  { %1078 = vmatprep.subr.mxu1 %v358_v6  ;;  %999 = vmatpush3.msra.mxu0 %v310_v7 }
  0x41   :  { %1079 = vmatpush3.msra.mxu1 %v342_v8  ;;  %1000 = vmatprep.subr.mxu0 %v325_v9 }
  0x42   :  { %1080 = vmatprep.subr.mxu1 %v357_v10  ;;  %1001 = vmatpush3.msra.mxu0 %v309_v11 }
  0x43   :  { %1081 = vmatpush3.msra.mxu1 %v341_v12  ;;  %1002 = vmatprep.subr.mxu0 %v324_v13 }
  0x44   :  { %1082 = vmatprep.subr.mxu1 %v356_v14  ;;  %1003 = vmatpush3.msra.mxu0 %v308_v15 }
  0x45   :  { %1083 = vmatpush3.msra.mxu1 %v340_v16  ;;  %1166 = vmatprep.subr.mxu0 %v1319_v39 }
  0x46   :  { %1201 = vmatprep.subr.mxu1 %v1319_v39 }
  0x97   :  { %v70_v22 = vpop.permute.xlu0 %69  ;;  %v76_v24 = vpop.permute.xlu1 %75 }
  0x98   :  { %vm117_vm0 = vcmp.eq.s32.totalorder %v70_v22, %v1409_v19  ;;  %vm119_vm1 = vcmp.eq.s32.totalorder %v70_v22, %v1412_v20  ;;  %vm116_vm2 = vcmp.eq.s32.totalorder %v70_v22, %v1406_v18  ;;  %vm118_vm3 = vcmp.eq.s32.totalorder %v70_v22, %v1415_v21 }
  0x99   :  { %907 = vmatprep.mubr.msk.f32.mxu0 %vm117_vm0, %v1318_v23  ;;  %939 = vmatprep.mubr.msk.f32.mxu1 %vm119_vm1, %v1318_v23  ;;  %vm125_vm4 = vcmp.eq.s32.totalorder %v76_v24, %v1409_v19  ;;  %vm127_vm5 = vcmp.eq.s32.totalorder %v76_v24, %v1412_v20  ;;  %vm124_vm10 = vcmp.eq.s32.totalorder %v76_v24, %v1406_v18 }
  0x9a   :  { %908 = vmatmul.mubr.msk.f32.vlgmr.msra.gmra.mxu0 %vm116_vm2, %v1318_v23  ;;  %940 = vmatmul.mubr.msk.f32.vlgmr.msra.gmra.mxu1 %vm118_vm3, %v1318_v23  ;;  %vm126_vm11 = vcmp.eq.s32.totalorder %v76_v24, %v1415_v21 }
  0x9b   :  { %v73_v25 = vpop.permute.xlu0 %72  ;;  %v79_v26 = vpop.permute.xlu1 %78  ;;  %1202 = vmatpush3.msra.mxu1 %v748_v40 }
  0x9c   :  { %vm121_vm6 = vcmp.eq.s32.totalorder %v73_v25, %v1409_v19  ;;  %vm123_vm7 = vcmp.eq.s32.totalorder %v73_v25, %v1412_v20  ;;  %vm120_vm8 = vcmp.eq.s32.totalorder %v73_v25, %v1406_v18  ;;  %vm122_vm9 = vcmp.eq.s32.totalorder %v73_v25, %v1415_v21  ;;  %1203 = vmatprep.subr.mxu1 %v1319_v39 }
  0x9d   :  { %909 = vmatprep.mubr.msk.f32.mxu0 %vm121_vm6, %v1318_v23  ;;  %941 = vmatprep.mubr.msk.f32.mxu1 %vm123_vm7, %v1318_v23  ;;  %vm129_vm12 = vcmp.eq.s32.totalorder %v79_v26, %v1409_v19  ;;  %vm131_vm13 = vcmp.eq.s32.totalorder %v79_v26, %v1412_v20  ;;  %vm128_vm14 = vcmp.eq.s32.totalorder %v79_v26, %v1406_v18 }
  0x9e   :  { %910 = vmatmul.mubr.msk.f32.gmra.mxu0 %vm120_vm8, %v1318_v23  ;;  %942 = vmatmul.mubr.msk.f32.gmra.mxu1 %vm122_vm9, %v1318_v23  ;;  %vm130_vm15 = vcmp.eq.s32.totalorder %v79_v26, %v1415_v21 }
  0x9f   :  { %911 = vmatprep.mubr.msk.f32.mxu0 %vm125_vm4, %v1318_v23  ;;  %943 = vmatprep.mubr.msk.f32.mxu1 %vm127_vm5, %v1318_v23  ;;  %v82_v27 = vpop.permute.xlu0 %81  ;;  %v85_v28 = vpop.permute.xlu1 %84 }
  0xa0   :  { %vm133_vm0 = vcmp.eq.s32.totalorder %v82_v27, %v1409_v19  ;;  %vm135_vm1 = vcmp.eq.s32.totalorder %v82_v27, %v1412_v20  ;;  %vm132_vm2 = vcmp.eq.s32.totalorder %v82_v27, %v1406_v18  ;;  %vm134_vm3 = vcmp.eq.s32.totalorder %v82_v27, %v1415_v21  ;;  %1204 = vmatpush3.msra.mxu1 %v747_v41 }
  0xa1   :  { %vm137_vm4 = vcmp.eq.s32.totalorder %v85_v28, %v1409_v19  ;;  %vm139_vm5 = vcmp.eq.s32.totalorder %v85_v28, %v1412_v20  ;;  %vm136_vm6 = vcmp.eq.s32.totalorder %v85_v28, %v1406_v18  ;;  %vm138_vm7 = vcmp.eq.s32.totalorder %v85_v28, %v1415_v21  ;;  %1205 = vmatprep.subr.mxu1 %v1319_v39 }
  0xa2   :  { %912 = vmatmul.mubr.msk.f32.gmra.mxu0 %vm124_vm10, %v1318_v23  ;;  %944 = vmatmul.mubr.msk.f32.gmra.mxu1 %vm126_vm11, %v1318_v23 }
  0xa3   :  { %913 = vmatprep.mubr.msk.f32.mxu0 %vm129_vm12, %v1318_v23  ;;  %945 = vmatprep.mubr.msk.f32.mxu1 %vm131_vm13, %v1318_v23  ;;  %v88_v29 = vpop.permute.xlu0 %87  ;;  %v91_v30 = vpop.permute.xlu1 %90 }
  0xa4   :  { %vm141_vm8 = vcmp.eq.s32.totalorder %v88_v29, %v1409_v19  ;;  %vm143_vm9 = vcmp.eq.s32.totalorder %v88_v29, %v1412_v20  ;;  %vm140_vm10 = vcmp.eq.s32.totalorder %v88_v29, %v1406_v18  ;;  %vm142_vm11 = vcmp.eq.s32.totalorder %v88_v29, %v1415_v21  ;;  %1206 = vmatpush3.msra.mxu1 %v746_v42 }
  0xa5   :  { %vm145_vm12 = vcmp.eq.s32.totalorder %v91_v30, %v1409_v19  ;;  %vm147_vm13 = vcmp.eq.s32.totalorder %v91_v30, %v1412_v20  ;;  %1207 = vmatprep.subr.mxu1 %v1319_v39 }
  0xa6   :  { %914 = vmatmul.mubr.msk.f32.gmra.mxu0 %vm128_vm14, %v1318_v23  ;;  %946 = vmatmul.mubr.msk.f32.gmra.mxu1 %vm130_vm15, %v1318_v23  ;;  %vm144_vm14 = vcmp.eq.s32.totalorder %v91_v30, %v1406_v18  ;;  %vm146_vm15 = vcmp.eq.s32.totalorder %v91_v30, %v1415_v21 }
  0xa7   :  { %915 = vmatprep.mubr.msk.f32.mxu0 %vm133_vm0, %v1318_v23  ;;  %947 = vmatprep.mubr.msk.f32.mxu1 %vm135_vm1, %v1318_v23  ;;  %v94_v31 = vpop.permute.xlu0 %93  ;;  %v97_v32 = vpop.permute.xlu1 %96 }
  0xa8   :  { %vm149_vm0 = vcmp.eq.s32.totalorder %v94_v31, %v1409_v19  ;;  %vm151_vm1 = vcmp.eq.s32.totalorder %v94_v31, %v1412_v20  ;;  %1208 = vmatpush3.msra.mxu1 %v745_v43 }
  0xa9   :  { %1209 = vmatprep.subr.mxu1 %v1319_v39 }
  0xaa   :  { %916 = vmatmul.mubr.msk.f32.gmra.mxu0 %vm132_vm2, %v1318_v23  ;;  %948 = vmatmul.mubr.msk.f32.gmra.mxu1 %vm134_vm3, %v1318_v23  ;;  %vm148_vm2 = vcmp.eq.s32.totalorder %v94_v31, %v1406_v18  ;;  %vm150_vm3 = vcmp.eq.s32.totalorder %v94_v31, %v1415_v21 }
  0xab   :  { %917 = vmatprep.mubr.msk.f32.mxu0 %vm137_vm4, %v1318_v23  ;;  %949 = vmatprep.mubr.msk.f32.mxu1 %vm139_vm5, %v1318_v23  ;;  %vm153_vm4 = vcmp.eq.s32.totalorder %v97_v32, %v1409_v19  ;;  %vm155_vm5 = vcmp.eq.s32.totalorder %v97_v32, %v1412_v20  ;;  %v100_v33 = vpop.permute.xlu0 %99  ;;  %v103_v34 = vpop.permute.xlu1 %102 }
  0xac   :  { %1210 = vmatpush3.msra.mxu1 %v744_v44 }
  0xad   :  { %1211 = vmatprep.subr.mxu1 %v1319_v39 }
  0xae   :  { %918 = vmatmul.mubr.msk.f32.gmra.mxu0 %vm136_vm6, %v1318_v23  ;;  %950 = vmatmul.mubr.msk.f32.gmra.mxu1 %vm138_vm7, %v1318_v23  ;;  %vm152_vm6 = vcmp.eq.s32.totalorder %v97_v32, %v1406_v18  ;;  %vm154_vm7 = vcmp.eq.s32.totalorder %v97_v32, %v1415_v21 }
  0xaf   :  { %919 = vmatprep.mubr.msk.f32.mxu0 %vm141_vm8, %v1318_v23  ;;  %951 = vmatprep.mubr.msk.f32.mxu1 %vm143_vm9, %v1318_v23  ;;  %vm157_vm8 = vcmp.eq.s32.totalorder %v100_v33, %v1409_v19  ;;  %vm159_vm9 = vcmp.eq.s32.totalorder %v100_v33, %v1412_v20  ;;  %v106_v35 = vpop.permute.xlu0 %105  ;;  %v109_v36 = vpop.permute.xlu1 %108 }
  0xb0   :  { %1212 = vmatpush3.msra.mxu1 %v743_v45 }
  0xb1   :  { %1213 = vmatprep.subr.mxu1 %v1319_v39 }
  0xb2   :  { %920 = vmatmul.mubr.msk.f32.gmra.mxu0 %vm140_vm10, %v1318_v23  ;;  %952 = vmatmul.mubr.msk.f32.gmra.mxu1 %vm142_vm11, %v1318_v23  ;;  %vm156_vm10 = vcmp.eq.s32.totalorder %v100_v33, %v1406_v18  ;;  %vm158_vm11 = vcmp.eq.s32.totalorder %v100_v33, %v1415_v21 }
  0xb3   :  { %921 = vmatprep.mubr.msk.f32.mxu0 %vm145_vm12, %v1318_v23  ;;  %953 = vmatprep.mubr.msk.f32.mxu1 %vm147_vm13, %v1318_v23  ;;  %vm161_vm12 = vcmp.eq.s32.totalorder %v103_v34, %v1409_v19  ;;  %vm163_vm13 = vcmp.eq.s32.totalorder %v103_v34, %v1412_v20  ;;  %v112_v37 = vpop.permute.xlu0 %111  ;;  %v115_v38 = vpop.permute.xlu1 %114 }
  0xb4   :  { %1214 = vmatpush3.msra.mxu1 %v742_v46 }
  0xb5   :  { %1215 = vmatprep.subr.mxu1 %v1319_v39 }
  0xb6   :  { %922 = vmatmul.mubr.msk.f32.gmra.mxu0 %vm144_vm14, %v1318_v23  ;;  %954 = vmatmul.mubr.msk.f32.gmra.mxu1 %vm146_vm15, %v1318_v23  ;;  %vm160_vm14 = vcmp.eq.s32.totalorder %v103_v34, %v1406_v18  ;;  %vm162_vm15 = vcmp.eq.s32.totalorder %v103_v34, %v1415_v21 }
  0xb7   :  { %923 = vmatprep.mubr.msk.f32.mxu0 %vm149_vm0, %v1318_v23  ;;  %955 = vmatprep.mubr.msk.f32.mxu1 %vm151_vm1, %v1318_v23  ;;  %vm165_vm0 = vcmp.eq.s32.totalorder %v106_v35, %v1409_v19  ;;  %vm167_vm1 = vcmp.eq.s32.totalorder %v106_v35, %v1412_v20 }
  0xb8   :  { %1216 = vmatpush3.msra.mxu1 %v741_v47 }
  0xb9   :  { %1217 = vmatprep.subr.mxu1 %v1319_v39 }
  0xba   :  { %924 = vmatmul.mubr.msk.f32.gmra.mxu0 %vm148_vm2, %v1318_v23  ;;  %956 = vmatmul.mubr.msk.f32.gmra.mxu1 %vm150_vm3, %v1318_v23  ;;  %vm164_vm2 = vcmp.eq.s32.totalorder %v106_v35, %v1406_v18  ;;  %vm166_vm3 = vcmp.eq.s32.totalorder %v106_v35, %v1415_v21 }
  0xbb   :  { %925 = vmatprep.mubr.msk.f32.mxu0 %vm153_vm4, %v1318_v23  ;;  %957 = vmatprep.mubr.msk.f32.mxu1 %vm155_vm5, %v1318_v23  ;;  %vm169_vm4 = vcmp.eq.s32.totalorder %v109_v36, %v1409_v19  ;;  %vm171_vm5 = vcmp.eq.s32.totalorder %v109_v36, %v1412_v20 }
  0xbc   :  { %1218 = vmatpush3.msra.mxu1 %v740_v48 }
  0xbd   :  { %1219 = vmatprep.subr.mxu1 %v1319_v39 }
  0xbe   :  { %926 = vmatmul.mubr.msk.f32.gmra.mxu0 %vm152_vm6, %v1318_v23  ;;  %958 = vmatmul.mubr.msk.f32.gmra.mxu1 %vm154_vm7, %v1318_v23  ;;  %vm168_vm6 = vcmp.eq.s32.totalorder %v109_v36, %v1406_v18  ;;  %vm170_vm7 = vcmp.eq.s32.totalorder %v109_v36, %v1415_v21 }
  0xbf   :  { %927 = vmatprep.mubr.msk.f32.mxu0 %vm157_vm8, %v1318_v23  ;;  %959 = vmatprep.mubr.msk.f32.mxu1 %vm159_vm9, %v1318_v23  ;;  %vm173_vm8 = vcmp.eq.s32.totalorder %v112_v37, %v1409_v19  ;;  %vm175_vm9 = vcmp.eq.s32.totalorder %v112_v37, %v1412_v20 }
  0xc0   :  { %1220 = vmatpush3.msra.mxu1 %v739_v49 }
  0xc1   :  { %1221 = vmatprep.subr.mxu1 %v1319_v39 }
  0xc2   :  { %928 = vmatmul.mubr.msk.f32.gmra.mxu0 %vm156_vm10, %v1318_v23  ;;  %960 = vmatmul.mubr.msk.f32.gmra.mxu1 %vm158_vm11, %v1318_v23  ;;  %vm172_vm10 = vcmp.eq.s32.totalorder %v112_v37, %v1406_v18  ;;  %vm174_vm11 = vcmp.eq.s32.totalorder %v112_v37, %v1415_v21 }
  0xc3   :  { %929 = vmatprep.mubr.msk.f32.mxu0 %vm161_vm12, %v1318_v23  ;;  %961 = vmatprep.mubr.msk.f32.mxu1 %vm163_vm13, %v1318_v23  ;;  %vm177_vm12 = vcmp.eq.s32.totalorder %v115_v38, %v1409_v19  ;;  %vm179_vm13 = vcmp.eq.s32.totalorder %v115_v38, %v1412_v20 }
  0xc4   :  { %1222 = vmatpush3.msra.mxu1 %v738_v50 }
  0xc5   :  { %1223 = vmatprep.subr.mxu1 %v1319_v39 }
  0xc6   :  { %930 = vmatmul.mubr.msk.f32.gmra.mxu0 %vm160_vm14, %v1318_v23  ;;  %962 = vmatmul.mubr.msk.f32.gmra.mxu1 %vm162_vm15, %v1318_v23  ;;  %vm176_vm14 = vcmp.eq.s32.totalorder %v115_v38, %v1406_v18  ;;  %vm178_vm15 = vcmp.eq.s32.totalorder %v115_v38, %v1415_v21 }
  0xc7   :  { %931 = vmatprep.mubr.msk.f32.mxu0 %vm165_vm0, %v1318_v23  ;;  %963 = vmatprep.mubr.msk.f32.mxu1 %vm167_vm1, %v1318_v23  ;;  %vm1320_vm0 = vmmov 0  }
  0xc8   :  { %1224 = vmatpush3.msra.mxu1 %v737_v51 }
  0xc9   :  { %1225 = vmatprep.subr.mxu1 %v1319_v39 }
  0xca   :  { %932 = vmatmul.mubr.msk.f32.gmra.mxu0 %vm164_vm2, %v1318_v23  ;;  %964 = vmatmul.mubr.msk.f32.gmra.mxu1 %vm166_vm3, %v1318_v23 }
  0xcb   :  { %933 = vmatprep.mubr.msk.f32.mxu0 %vm169_vm4, %v1318_v23  ;;  %965 = vmatprep.mubr.msk.f32.mxu1 %vm171_vm5, %v1318_v23 }
  0xcc   :  { %1226 = vmatpush3.msra.mxu1 %v736_v52 }
  0xcd   :  { %1227 = vmatprep.subr.mxu1 %v1319_v39 }
  0xce   :  { %934 = vmatmul.mubr.msk.f32.gmra.mxu0 %vm168_vm6, %v1318_v23  ;;  %966 = vmatmul.mubr.msk.f32.gmra.mxu1 %vm170_vm7, %v1318_v23 }
  0xcf   :  { %935 = vmatprep.mubr.msk.f32.mxu0 %vm173_vm8, %v1318_v23  ;;  %967 = vmatprep.mubr.msk.f32.mxu1 %vm175_vm9, %v1318_v23 }
  0xd0   :  { %1228 = vmatpush3.msra.mxu1 %v735_v53 }
  0xd1   :  { %1229 = vmatprep.subr.mxu1 %v1319_v39 }
  0xd2   :  { %936 = vmatmul.mubr.msk.f32.gmra.mxu0 %vm172_vm10, %v1318_v23  ;;  %968 = vmatmul.mubr.msk.f32.gmra.mxu1 %vm174_vm11, %v1318_v23 }
  0xd3   :  { %937 = vmatprep.mubr.msk.f32.mxu0 %vm177_vm12, %v1318_v23  ;;  %969 = vmatprep.mubr.msk.f32.mxu1 %vm179_vm13, %v1318_v23 }
  0xd4   :  { %1230 = vmatpush3.msra.mxu1 %v734_v54 }
  0xd5   :  { %1231 = vmatprep.subr.mxu1 %v1319_v39 }
  0xd6   :  { %938 = vmatmul.mubr.msk.f32.gmra.mxu0 %vm176_vm14, %v1318_v23  ;;  %970 = vmatmul.mubr.msk.f32.gmra.mxu1 %vm178_vm15, %v1318_v23 }
  0xd7   :  { %1198 = vmatprep.mubr.msk.f32.mxu0 %vm1320_vm0, %v1319_v39  ;;  %1233 = vmatprep.mubr.msk.f32.mxu1 %vm1320_vm0, %v1319_v39 }
  0xd8   :  { %1232 = vmatpush3.msra.mxu1 %v733_v55 }
 0x15a   :  { %v1004_v56 = vpop.f32.mrf.mxu0  ;;  %v1084_v57 = vpop.f32.mrf.mxu1 }
 0x15c   :  { %v1005_v58 = vpop.f32.mrf.mxu0  ;;  %v1085_v59 = vpop.f32.mrf.mxu1 }
 0x15d   :  { %v1006_v60 = vadd.f32 %v1005_v58, %v1004_v56  ;;  %v1086_v61 = vadd.f32 %v1085_v59, %v1084_v57 }
 0x15e   :  { %v1007_v62 = vpop.f32.mrf.mxu0  ;;  %v1087_v63 = vpop.f32.mrf.mxu1 }
 0x15f   :  { %v1612_v0 = vadd.f32 %v1086_v61, %v1006_v60 }
 0x160   :  { %v1008_v1 = vpop.f32.mrf.mxu0  ;;  %v1088_v2 = vpop.f32.mrf.mxu1 }
 0x161   :  { %v1009_v3 = vadd.f32 %v1008_v1, %v1007_v62  ;;  %v1089_v4 = vadd.f32 %v1088_v2, %v1087_v63 }
 0x162   :  { %v1010_v5 = vpop.f32.mrf.mxu0  ;;  %v1090_v6 = vpop.f32.mrf.mxu1 }
 0x163   :  { %v1614_v7 = vadd.f32 %v1089_v4, %v1009_v3 }
 0x164   :  { %v1011_v8 = vpop.f32.mrf.mxu0  ;;  %v1091_v9 = vpop.f32.mrf.mxu1 }
 0x165   :  { %v1012_v10 = vadd.f32 %v1011_v8, %v1010_v5  ;;  %v1092_v11 = vadd.f32 %v1091_v9, %v1090_v6 }
 0x166   :  { %v1013_v12 = vpop.f32.mrf.mxu0  ;;  %v1093_v13 = vpop.f32.mrf.mxu1 }
 0x167   :  { %v1616_v14 = vadd.f32 %v1092_v11, %v1012_v10 }
 0x168   :  { %v1014_v15 = vpop.f32.mrf.mxu0  ;;  %v1094_v16 = vpop.f32.mrf.mxu1 }
 0x169   :  { %v1015_v17 = vadd.f32 %v1014_v15, %v1013_v12  ;;  %v1095_v18 = vadd.f32 %v1094_v16, %v1093_v13 }
 0x16a   :  { %v1016_v19 = vpop.f32.mrf.mxu0  ;;  %v1096_v20 = vpop.f32.mrf.mxu1 }
 0x16b   :  { %v1618_v21 = vadd.f32 %v1095_v18, %v1015_v17 }
 0x16c   :  { %v1017_v22 = vpop.f32.mrf.mxu0  ;;  %v1097_v23 = vpop.f32.mrf.mxu1 }
 0x16d   :  { %v1018_v24 = vadd.f32 %v1017_v22, %v1016_v19  ;;  %v1098_v25 = vadd.f32 %v1097_v23, %v1096_v20 }
 0x16e   :  { %v1620_v26 = vpop.f32.mrf.mxu0  ;;  %v1622_v27 = vpop.f32.mrf.mxu1 }
 0x16f   :  { %v1624_v28 = vadd.f32 %v1098_v25, %v1018_v24 }
 0x170   :  { %v1626_v29 = vpop.f32.mrf.mxu0  ;;  %v1628_v30 = vpop.f32.mrf.mxu1 }
 0x172   :  { %v1630_v31 = vpop.f32.mrf.mxu0  ;;  %v1632_v32 = vpop.f32.mrf.mxu1 }
 0x174   :  { %v1634_v33 = vpop.f32.mrf.mxu0  ;;  %v1636_v34 = vpop.f32.mrf.mxu1 }
 0x176   :  { %v1638_v35 = vpop.f32.mrf.mxu0  ;;  %v1640_v36 = vpop.f32.mrf.mxu1 }
 0x178   :  { %v1642_v37 = vpop.f32.mrf.mxu0  ;;  %v1644_v38 = vpop.f32.mrf.mxu1 }
 0x17a   :  { %v1028_v40 = vpop.f32.mrf.mxu0  ;;  %v1108_v41 = vpop.f32.mrf.mxu1 }
 0x17c   :  { %v1029_v42 = vpop.f32.mrf.mxu0  ;;  %v1109_v43 = vpop.f32.mrf.mxu1 }
 0x17e   :  { %v1031_v44 = vpop.f32.mrf.mxu0  ;;  %v1111_v45 = vpop.f32.mrf.mxu1 }
 0x180   :  { %v1032_v46 = vpop.f32.mrf.mxu0  ;;  %v1112_v47 = vpop.f32.mrf.mxu1 }
 0x182   :  { %v1034_v48 = vpop.f32.mrf.mxu0  ;;  %v1114_v49 = vpop.f32.mrf.mxu1 }
 0x184   :  { %v1035_v50 = vpop.f32.mrf.mxu0  ;;  %v1115_v51 = vpop.f32.mrf.mxu1 }
 0x185   :  { %v1036_v25 = vadd.f32 %v1035_v50, %v1034_v48  ;;  %v1027_v48 = vadd.f32 %v1642_v37, %v1638_v35  ;;  %v1021_v35 = vadd.f32 %v1626_v29, %v1620_v26  ;;  %v662_v26 = vld [vmem:[#allocation2] sm:$0xff] }
 0x186   :  { %v1037_v52 = vpop.f32.mrf.mxu0  ;;  %v1117_v53 = vpop.f32.mrf.mxu1 }
 0x188   :  { %v1038_v54 = vpop.f32.mrf.mxu0  ;;  %v1118_v55 = vpop.f32.mrf.mxu1 }
 0x189   :  { %v1039_v22 = vadd.f32 %v1038_v54, %v1037_v52  ;;  %v1119_v23 = vadd.f32 %v1118_v55, %v1117_v53 }
 0x18a   :  { %v1040_v56 = vpop.f32.mrf.mxu0  ;;  %v1120_v57 = vpop.f32.mrf.mxu1 }
 0x18c   :  { %v1041_v58 = vpop.f32.mrf.mxu0  ;;  %v1121_v59 = vpop.f32.mrf.mxu1 }
 0x18d   :  { %v1042_v18 = vadd.f32 %v1041_v58, %v1040_v56  ;;  %v1122_v19 = vadd.f32 %v1121_v59, %v1120_v57  ;;  %v639_v56 = vadd.f32 %v1119_v23, %v1039_v22  ;;  %v1030_v57 = vadd.f32 %v1029_v42, %v1028_v40 }
 0x18e   :  { %v1043_v60 = vpop.f32.mrf.mxu0  ;;  %v1123_v61 = vpop.f32.mrf.mxu1  ;;  %v1110_v58 = vadd.f32 %v1109_v43, %v1108_v41  ;;  %v1104_v40 = vadd.f32 %v1636_v34, %v1632_v32 }
 0x190   :  { %v1044_v62 = vpop.f32.mrf.mxu0  ;;  %v1124_v63 = vpop.f32.mrf.mxu1  ;;  %v624_v41 = vadd.f32 %v1110_v58, %v1030_v57 }
 0x191   :  { %v1045_v15 = vadd.f32 %v1044_v62, %v1043_v60  ;;  %v1125_v16 = vadd.f32 %v1124_v63, %v1123_v61  ;;  %v1033_v60 = vadd.f32 %v1032_v46, %v1031_v44  ;;  %v1113_v61 = vadd.f32 %v1112_v47, %v1111_v45 }
 0x192   :  { %v1046_v1 = vpop.f32.mrf.mxu0  ;;  %v1126_v2 = vpop.f32.mrf.mxu1  ;;  %v1024_v44 = vadd.f32 %v1634_v33, %v1630_v31 }
 0x193   :  { %v649_v24 = vadd.f32 %v1125_v16, %v1045_v15  ;;  %v629_v50 = vadd.f32 %v1113_v61, %v1033_v60 }
 0x194   :  { %v1047_v3 = vpop.f32.mrf.mxu0  ;;  %v1127_v4 = vpop.f32.mrf.mxu1 }
 0x195   :  { %v1048_v10 = vadd.f32 %v1047_v3, %v1046_v1  ;;  %v1128_v11 = vadd.f32 %v1127_v4, %v1126_v2  ;;  %v1116_v1 = vadd.f32 %v1115_v51, %v1114_v49  ;;  %v644_v2 = vadd.f32 %v1122_v19, %v1042_v18 }
 0x196   :  { %v1049_v5 = vpop.f32.mrf.mxu0  ;;  %v1129_v6 = vpop.f32.mrf.mxu1  ;;  %v1107_v49 = vadd.f32 %v1644_v38, %v1640_v36  ;;  %v1101_v36 = vadd.f32 %v1628_v30, %v1622_v27  ;;  %v614_v38 = vadd.f32 %v1104_v40, %v1024_v44 }
 0x197   :  { %v654_v20 = vadd.f32 %v1128_v11, %v1048_v10  ;;  %v634_v52 = vadd.f32 %v1116_v1, %v1036_v25 }
 0x198   :  { %v1050_v8 = vpop.f32.mrf.mxu0  ;;  %v1130_v9 = vpop.f32.mrf.mxu1  ;;  %v619_v37 = vadd.f32 %v1107_v49, %v1027_v48  ;;  %v609_v31 = vadd.f32 %v1101_v36, %v1021_v35 }
 0x199   :  { %v1051_v12 = vadd.f32 %v1050_v8, %v1049_v5  ;;  %v1131_v13 = vadd.f32 %v1130_v9, %v1129_v6 }
 0x19b   :  { %v659_v17 = vadd.f32 %v1131_v13, %v1051_v12 }
 0x19d   :  { %1167 = vmatpush3.msra.mxu0 %v659_v17 }
 0x19e   :  { %1168 = vmatprep.subr.mxu0 %v1319_v39 }
 0x19f   :  { %1169 = vmatpush3.msra.mxu0 %v654_v20 }
 0x1a0   :  { %1170 = vmatprep.subr.mxu0 %v1319_v39 }
 0x1a1   :  { %1171 = vmatpush3.msra.mxu0 %v649_v24 }
 0x1a2   :  { %1172 = vmatprep.subr.mxu0 %v1319_v39 }
 0x1a3   :  { %1173 = vmatpush3.msra.mxu0 %v644_v2 }
 0x1a4   :  { %1174 = vmatprep.subr.mxu0 %v1319_v39 }
 0x1a5   :  { %1175 = vmatpush3.msra.mxu0 %v639_v56 }
 0x1a6   :  { %1176 = vmatprep.subr.mxu0 %v1319_v39 }
 0x1a7   :  { %1177 = vmatpush3.msra.mxu0 %v634_v52 }
 0x1a8   :  { %1178 = vmatprep.subr.mxu0 %v1319_v39 }
 0x1a9   :  { %1179 = vmatpush3.msra.mxu0 %v629_v50 }
 0x1aa   :  { %1180 = vmatprep.subr.mxu0 %v1319_v39 }
 0x1ab   :  { %1181 = vmatpush3.msra.mxu0 %v624_v41 }
 0x1ac   :  { %1182 = vmatprep.subr.mxu0 %v1319_v39 }
 0x1ad   :  { %1183 = vmatpush3.msra.mxu0 %v619_v37 }
 0x1ae   :  { %1184 = vmatprep.subr.mxu0 %v1319_v39 }
 0x1af   :  { %1185 = vmatpush3.msra.mxu0 %v614_v38 }
 0x1b0   :  { %1186 = vmatprep.subr.mxu0 %v1319_v39 }
 0x1b1   :  { %1187 = vmatpush3.msra.mxu0 %v609_v31 }
 0x1b2   :  { %1188 = vmatprep.subr.mxu0 %v1319_v39 }
 0x1b3   :  { %1189 = vmatpush3.msra.mxu0 %v1624_v28 }
 0x1b4   :  { %1190 = vmatprep.subr.mxu0 %v1319_v39 }
 0x1b5   :  { %1191 = vmatpush3.msra.mxu0 %v1618_v21  ;;  %v971_v21 = vld [vmem:[%s1688_s4] ss:$0 sm:$0xff] }
 0x1b6   :  { %1192 = vmatprep.subr.mxu0 %v1319_v39 }
 0x1b7   :  { %1193 = vmatpush3.msra.mxu0 %v1616_v14 }
 0x1b8   :  { %1194 = vmatprep.subr.mxu0 %v1319_v39 }
 0x1b9   :  { %1195 = vmatpush3.msra.mxu0 %v1614_v7 }
 0x1ba   :  { %1196 = vmatprep.subr.mxu0 %v1319_v39 }
 0x1bb   :  { %1197 = vmatpush3.msra.mxu0 %v1612_v0 }
 0x1bc   :  { %1199 = vmatmul.mubr.f32.vlgmr.msra.gmra.mxu0 %v662_v26 }
 0x27c   :  { %v729_v27 = vpop.f32.mrf.mxu0 }
 0x27d   :  { %1234 = vmatmul.mubr.f32.vlgmr.msra.gmra.mxu1 %v729_v27 }
 0x27e   :  { %v1200_v28 = vpop.f32.mrf.mxu0 }
 0x33d   :  { %v822_v14 = vpop.f32.mrf.mxu1 }
 0x33e   :  { %v823_v29 = vadd.f32 %v971_v21, %v822_v14 }
 0x33f   :  { %v1235_v30 = vpop.f32.mrf.mxu1 }
 0x340   :  { %826 = vst [vmem:[#allocation7] sm:$0xff] %v823_v29 }
 0x341   :  { %1298 = shalt.err (!%p1295_p0)
}
 0x342   :  { %836 = dma.vmem_to_hbm [thread:$0]  %s834_s13, 128, %s1689_s5, [#allocation4]  }
 0x343   :  { %1311 = dma.done.wait [#allocation4], 128  }
 0x344   :  { %1312 = vsyncadd [#allocation4], 4294967168 }
 0x345   :  { %840 = vsyncpa [#allocation3], 1 }
 0x346   :  { %841 = vsyncpa [#allocation6], 1 }
 0x347   :  { %842 = vsyncpa [#allocation4], 1 }

</bundles_post_ra>
